<compile_context>
chip_gen: v5e
topology: v5e:2x2
jax: 0.10.0
libtpu: 0.0.40
codegen_flags: <defaults>
</compile_context>

<pallas_src>
import functools

import jax
import jax.numpy as jnp
from jax.experimental import pallas as pl
from jax.experimental.pallas import tpu as pltpu


def ffn_kernel(x_ref, w1_ref, b1_ref, w2_ref, b2_ref, o_ref):
    # x tile arrives in its native dtype (f32); cast to the compute dtype
    # (bf16) in-kernel so the wrapper does not need a separate cast pass.
    x = x_ref[...].astype(w1_ref.dtype)
    # First linear: MXU matmul, f32 accumulation.
    h = jnp.dot(x, w1_ref[...], preferred_element_type=jnp.float32)
    # Bias add + ReLU in f32 (keep elementwise work f32: v5e VPU has no bf16).
    h = jnp.maximum(h + b1_ref[...], 0.0)
    # Second linear: feed the MXU in the compute dtype, accumulate in f32.
    y = jnp.dot(h.astype(w2_ref.dtype), w2_ref[...],
                preferred_element_type=jnp.float32)
    y = y + b2_ref[...]
    # TODO(synk): training-mode nn.Dropout would be fused here with
    # pltpu.prng_seed + pltpu.prng_random_bits (mask + 1/(1-p) scale before
    # the store); eval-mode dropout is the identity, which is what we do.
    o_ref[...] = y.astype(o_ref.dtype)


def _resident_spec(block_shape):
    """BlockSpec for an operand held resident across the grid (constant
    index_map). Single-buffered: nothing to pipeline, so don't pay 2x VMEM."""
    index_map = lambda i: (0,) * len(block_shape)
    try:
        return pl.BlockSpec(block_shape, index_map,
                            pipeline_mode=pl.Buffered(1))
    except TypeError:  # older jax without pipeline_mode on BlockSpec
        return pl.BlockSpec(block_shape, index_map)


def _vmem_budget_bytes():
    """One generation-aware number used both to size the tile and as
    vmem_limit_bytes: ~96 MiB on 128-MiB parts (v5e/v6e), 48 MiB on v7x."""
    try:
        cap = int(pltpu.get_tpu_info().vmem_capacity_bytes)
    except Exception:
        cap = 64 * 1024 * 1024          # conservative fallback: v7x per-core
    cap = min(cap, 128 * 1024 * 1024)   # per-core VMEM never exceeds 128 MiB
    return max(32 * 1024 * 1024,
               min(int(cap * 0.75), cap - 16 * 1024 * 1024))


def _choose_tile_m(M, C, H, in_bytes, compute_bytes, out_bytes, vmem_budget):
    """Largest 128-aligned M-tile whose working set fits the VMEM budget."""
    # Resident operands are single-buffered (see _resident_spec).
    # TODO(synk): for large models (C >= 1024, H = 4C) add an H-blocked inner
    # pipeline (pltpu.emit_pipeline over W1^T/W2^T chunks + f32 accumulator)
    # instead of holding both full weights resident; needed to keep tm large
    # inside v7x's 64 MiB VMEM.
    fixed = 2 * C * H * compute_bytes + (H + C) * 4

    m128 = ((M + 127) // 128) * 128
    candidates = [c for c in (2048, 1024, 512, 256, 128) if c <= m128]
    candidates += [64, 32, 16]          # tiny-M / tight-VMEM fallbacks

    tm = 16
    for cand in candidates:
        per_step = (2 * cand * C * in_bytes       # x tile, double-buffered
                    + 2 * cand * C * out_bytes    # out tile, double-buffered
                    + cand * C * compute_bytes    # bf16 x
                    + cand * H * 4                # f32 hidden (post-ReLU)
                    + cand * H * compute_bytes    # bf16 hidden for matmul 2
                    + cand * C * 4)               # f32 y before final cast
        if fixed + per_step <= vmem_budget:
            tm = cand
            break
    return tm


def feed_forward(x, w1, b1, w2, b2, *, compute_dtype=jnp.bfloat16, tile_m=None):
    """y = relu(x @ w1.T + b1) @ w2.T + b2  (dropout = identity, eval mode).

    Intended to run under jax.jit so the wrapper-side transpose/cast/pad fuse.

    x: (B, T, C) float32
    w1: (H, C), b1: (H,)   -- PyTorch nn.Linear layout (out_features, in_features)
    w2: (C, H), b2: (C,)
    """
    B, T, C = x.shape
    H = w1.shape[0]
    M = B * T

    # Pre-transpose once (fused / const-folded under jit) so the kernel does
    # row-major MXU matmuls. x itself stays f32 -- the cast happens in-kernel.
    w1_t = w1.T.astype(compute_dtype)                 # (C, H)
    w2_t = w2.T.astype(compute_dtype)                 # (H, C)
    b1r = b1.reshape(1, H).astype(jnp.float32)
    b2r = b2.reshape(1, C).astype(jnp.float32)
    x2 = x.reshape(M, C)

    in_bytes = jnp.dtype(x.dtype).itemsize
    cbytes = jnp.dtype(compute_dtype).itemsize
    obytes = jnp.dtype(x.dtype).itemsize

    vmem_budget = _vmem_budget_bytes()
    if tile_m is None:
        tm = _choose_tile_m(M, C, H, in_bytes, cbytes, obytes, vmem_budget)
    elif tile_m >= 128:
        tm = (tile_m // 128) * 128          # keep MXU-M / lane tiles unmasked
    else:
        tm = max(16, (tile_m // 16) * 16)   # bf16 sublane-packing minimum

    # Feed both v7x TensorCores: guarantee >= 2 grid steps when M allows
    # (>= 4 for larger M) without dropping below a 128-row tile.
    m128 = ((M + 127) // 128) * 128
    if m128 >= 2 * 128:
        min_steps = 4 if m128 >= 8 * 128 else 2
        tm = min(tm, max(128, (m128 // min_steps) // 128 * 128))

    # Pad M so the grid divides evenly; padded rows are discarded afterwards.
    n_steps = pl.cdiv(M, tm)
    M_pad = n_steps * tm
    if M_pad != M:
        x2 = jnp.pad(x2, ((0, M_pad - M), (0, 0)))

    flops = 4 * M * C * H                              # 2 matmuls, 2*M*C*H each
    bytes_accessed = (M * C * (in_bytes + obytes)      # x in (f32), y out
                      + 2 * C * H * cbytes             # weights (read once)
                      + (H + C) * 4)                   # biases

    out = pl.pallas_call(
        ffn_kernel,
        out_shape=jax.ShapeDtypeStruct((M_pad, C), x.dtype),
        grid=(n_steps,),
        in_specs=[
            pl.BlockSpec((tm, C), lambda i: (i, 0)),   # x tile (pipelined)
            _resident_spec((C, H)),                    # W1^T resident
            _resident_spec((1, H)),                    # b1 resident
            _resident_spec((H, C)),                    # W2^T resident
            _resident_spec((1, C)),                    # b2 resident
        ],
        out_specs=pl.BlockSpec((tm, C), lambda i: (i, 0)),
        compiler_params=pltpu.CompilerParams(
            # "parallel" lets the runtime shard the M grid across TCs on
            # megacore parts; switch to pltpu.CORE_PARALLEL if a v7x profile
            # shows one idle core.
            dimension_semantics=("parallel",),
            vmem_limit_bytes=vmem_budget,
        ),
        cost_estimate=pl.CostEstimate(
            flops=flops, transcendentals=0, bytes_accessed=bytes_accessed),
    )(x2, w1_t, b1r, w2_t, b2r)

    return out[:M].reshape(B, T, C)


if __name__ == "__main__":
    # MXU/lane-aligned demo shapes: n_embd = 128 keeps the output tile
    # lane-dense (unmasked stores); T = 60 exercises the pad-to-tile path.
    B, T, n_embd = 2, 60, 128
    hidden = 4 * n_embd            # 512
    dropout = 0.0                  # eval-mode -> identity

    key = jax.random.PRNGKey(0)
    kx, kxb, k1, kb1, k2, kb2 = jax.random.split(key, 6)

    x = jax.random.normal(kx, (B, T, n_embd), dtype=jnp.float32)

    # PyTorch nn.Linear stores weight as (out_features, in_features).
    w1 = jax.random.normal(k1, (hidden, n_embd), dtype=jnp.float32) * 0.02
    b1 = jax.random.normal(kb1, (hidden,), dtype=jnp.float32) * 0.02
    w2 = jax.random.normal(k2, (n_embd, hidden), dtype=jnp.float32) * 0.02
    b2 = jax.random.normal(kb2, (n_embd,), dtype=jnp.float32) * 0.02

    # jit so the wrapper-side transpose/cast/pad fuse around the pallas_call.
    ffn = jax.jit(feed_forward)
    ffn_small_tile = jax.jit(functools.partial(feed_forward, tile_m=16))

    # Auto tile (single 128-row tile here) and a forced tiny tile (grid of 8,
    # padded last rows) to exercise the pipelined / padded paths.
    out = jax.block_until_ready(ffn(x, w1, b1, w2, b2))
    out_tiled = jax.block_until_ready(ffn_small_tile(x, w1, b1, w2, b2))

    assert out.shape == (B, T, n_embd)
    assert out.dtype == x.dtype

    # Reference 1: identical bf16-matmul / f32-accumulate math in plain JAX.
    M = B * T
    xb = x.reshape(M, n_embd).astype(jnp.bfloat16)
    h_ref = jnp.maximum(
        jnp.dot(xb, w1.T.astype(jnp.bfloat16),
                preferred_element_type=jnp.float32) + b1, 0.0)
    y_ref = (jnp.dot(h_ref.astype(jnp.bfloat16), w2.T.astype(jnp.bfloat16),
                     preferred_element_type=jnp.float32) + b2)
    ref_bf16 = y_ref.reshape(B, T, n_embd).astype(x.dtype)

    assert jnp.allclose(out, ref_bf16, atol=1e-3, rtol=1e-3)
    assert jnp.allclose(out_tiled, ref_bf16, atol=1e-3, rtol=1e-3)
    assert jnp.allclose(out, out_tiled, atol=1e-5, rtol=1e-5)

    # Reference 2: full-f32 PyTorch semantics (bf16 MXU math within tolerance).
    ref_f32 = jnp.maximum(x @ w1.T + b1, 0.0) @ w2.T + b2
    assert jnp.allclose(out, ref_f32, atol=2e-2, rtol=2e-2)

    # Larger M exercises the >=2-step auto-tiled grid (v7x megacore path).
    x_big = jax.random.normal(kxb, (4, 256, n_embd), dtype=jnp.float32)
    out_big = jax.block_until_ready(ffn(x_big, w1, b1, w2, b2))
    ref_big = jnp.maximum(x_big @ w1.T + b1, 0.0) @ w2.T + b2
    assert out_big.shape == x_big.shape
    assert jnp.allclose(out_big, ref_big, atol=2e-2, rtol=2e-2)

    print("KERNEL_OK")
</pallas_src>

<mosaic_0001>
module attributes {stable_mosaic.version = 11 : i64} {
  func.func @ffn_kernel(%arg0: i32, %arg1: memref<128x128xf32, #tpu.memory_space<vmem>>, %arg2: memref<128x512xbf16, #tpu.memory_space<vmem>>, %arg3: memref<1x512xf32, #tpu.memory_space<vmem>>, %arg4: memref<512x128xbf16, #tpu.memory_space<vmem>>, %arg5: memref<1x128xf32, #tpu.memory_space<vmem>>, %arg6: memref<128x128xf32, #tpu.memory_space<vmem>>) attributes {dimension_semantics = [#tpu.dimension_semantics<parallel>], iteration_bounds = array<i64: 1>, scalar_prefetch = 0 : i64, scratch_operands = 0 : i64, tpu.core_type = #tpu.core_type<tc>, window_params = [{transform_indices = @transform_0, window_bounds = array<i64: 128, 128>}, {pipeline_mode = #tpu.pipeline_mode<synchronous>, transform_indices = @transform_1, window_bounds = array<i64: 128, 512>}, {pipeline_mode = #tpu.pipeline_mode<synchronous>, transform_indices = @transform_2, window_bounds = array<i64: 1, 512>}, {pipeline_mode = #tpu.pipeline_mode<synchronous>, transform_indices = @transform_3, window_bounds = array<i64: 512, 128>}, {pipeline_mode = #tpu.pipeline_mode<synchronous>, transform_indices = @transform_4, window_bounds = array<i64: 1, 128>}, {transform_indices = @transform_5, window_bounds = array<i64: 128, 128>}]} {
    %c0 = arith.constant 0 : index
    %c0_0 = arith.constant 0 : index
    %0 = vector.load %arg1[%c0, %c0_0] : memref<128x128xf32, #tpu.memory_space<vmem>>, vector<128x128xf32>
    %1 = arith.truncf %0 : vector<128x128xf32> to vector<128x128xbf16>
    %c0_1 = arith.constant 0 : index
    %c0_2 = arith.constant 0 : index
    %2 = vector.load %arg2[%c0_1, %c0_2] : memref<128x512xbf16, #tpu.memory_space<vmem>>, vector<128x512xbf16>
    %cst = arith.constant dense<0.000000e+00> : vector<128x512xf32>
    %3 = tpu.matmul %1, %2, %cst {dimension_numbers = #tpu.dot_dimension_numbers<[1], [0], [0], [1], [0, 0, 1, 1], [], []>} : vector<128x128xbf16>, vector<128x512xbf16>, vector<128x512xf32> -> vector<128x512xf32>
    %c0_3 = arith.constant 0 : index
    %c0_4 = arith.constant 0 : index
    %4 = vector.load %arg3[%c0_3, %c0_4] : memref<1x512xf32, #tpu.memory_space<vmem>>, vector<1x512xf32>
    %5 = vector.broadcast %4 : vector<1x512xf32> to vector<128x512xf32>
    %6 = arith.addf %3, %5 : vector<128x512xf32>
    %cst_5 = arith.constant 0.000000e+00 : f32
    %7 = vector.broadcast %cst_5 : f32 to vector<128x512xf32>
    %8 = arith.maximumf %6, %7 : vector<128x512xf32>
    %9 = arith.truncf %8 : vector<128x512xf32> to vector<128x512xbf16>
    %c0_6 = arith.constant 0 : index
    %c0_7 = arith.constant 0 : index
    %10 = vector.load %arg4[%c0_6, %c0_7] : memref<512x128xbf16, #tpu.memory_space<vmem>>, vector<512x128xbf16>
    %cst_8 = arith.constant dense<0.000000e+00> : vector<128x128xf32>
    %11 = tpu.matmul %9, %10, %cst_8 {dimension_numbers = #tpu.dot_dimension_numbers<[1], [0], [0], [1], [0, 0, 1, 1], [], []>} : vector<128x512xbf16>, vector<512x128xbf16>, vector<128x128xf32> -> vector<128x128xf32>
    %c0_9 = arith.constant 0 : index
    %c0_10 = arith.constant 0 : index
    %12 = vector.load %arg5[%c0_9, %c0_10] : memref<1x128xf32, #tpu.memory_space<vmem>>, vector<1x128xf32>
    %13 = vector.broadcast %12 : vector<1x128xf32> to vector<128x128xf32>
    %14 = arith.addf %11, %13 : vector<128x128xf32>
    %c0_11 = arith.constant 0 : index
    %c0_12 = arith.constant 0 : index
    %15 = vector.load %arg6[%c0_11, %c0_12] : memref<128x128xf32, #tpu.memory_space<vmem>>, vector<128x128xf32>
    tpu.vector_store %arg6[%c0_11, %c0_12], %14 {strides = array<i32>} : memref<128x128xf32, #tpu.memory_space<vmem>>, vector<128x128xf32>,
    return
  }
  func.func @transform_0(%arg0: i32) -> (i32, i32) {
    %c0_i32 = arith.constant 0 : i32
    %c0_i32_0 = arith.constant 0 : i32
    return %arg0, %c0_i32 : i32, i32
  }
  func.func @transform_1(%arg0: i32) -> (i32, i32) {
    %c0_i32 = arith.constant 0 : i32
    %c0_i32_0 = arith.constant 0 : i32
    %c0_i32_1 = arith.constant 0 : i32
    return %c0_i32, %c0_i32_0 : i32, i32
  }
  func.func @transform_2(%arg0: i32) -> (i32, i32) {
    %c0_i32 = arith.constant 0 : i32
    %c0_i32_0 = arith.constant 0 : i32
    %c0_i32_1 = arith.constant 0 : i32
    return %c0_i32, %c0_i32_0 : i32, i32
  }
  func.func @transform_3(%arg0: i32) -> (i32, i32) {
    %c0_i32 = arith.constant 0 : i32
    %c0_i32_0 = arith.constant 0 : i32
    %c0_i32_1 = arith.constant 0 : i32
    return %c0_i32, %c0_i32_0 : i32, i32
  }
  func.func @transform_4(%arg0: i32) -> (i32, i32) {
    %c0_i32 = arith.constant 0 : i32
    %c0_i32_0 = arith.constant 0 : i32
    %c0_i32_1 = arith.constant 0 : i32
    return %c0_i32, %c0_i32_0 : i32, i32
  }
  func.func @transform_5(%arg0: i32) -> (i32, i32) {
    %c0_i32 = arith.constant 0 : i32
    %c0_i32_0 = arith.constant 0 : i32
    return %arg0, %c0_i32 : i32, i32
  }
}

</mosaic_0001>

<bundles_post_ra>
// kernel: feed_forward.1
= control target key start
LH: loop header
LB: loop body
LE: loop exit
PB: predicated region body
PF: predicated region fallthrough
CT: control target
= control target key end

     0   :  { %s1845_s1 = inlined_call_operand.vmem [shape: bf16[128,512], index: 1, kind: input, shape index: {}]   ;;  %s1846_s0 = inlined_call_operand.vmem [shape: f32[128,128], index: 0, kind: input, shape index: {}]   ;;  %s1847_s3 = inlined_call_operand.vmem [shape: bf16[512,128], index: 3, kind: input, shape index: {}]   ;;  %s1848_s2 = inlined_call_operand.vmem [shape: f32[1,512], index: 2, kind: input, shape index: {}]   ;;  %s1849_s4 = inlined_call_operand.vmem [shape: f32[1,128], index: 4, kind: input, shape index: {}]   ;;  %s1850_s5 = inlined_call_operand.vmem [shape: f32[128,128], index: 5, kind: output, shape index: {}]  }
   0x1   :  { %v1128_v0 = vld [vmem:[%s1845_s1 + $0xe0] sm:$0xf]  ;;  %v1300_v1 = vld [vmem:[%s1845_s1 + $0xec] sm:$0xf0]  ;;  %v1298_v2 = vld [vmem:[%s1845_s1 + $0xe4] sm:$0xf] }
   0x2   :  { %v1129_v3 = vor.u32 %v1300_v1, %v1128_v0  ;;  %v1130_v4 = vld [vmem:[%s1845_s1 + $0xf0] sm:$0xf0]  ;;  %v1136_v5 = vld [vmem:[%s1845_s1 + $0xe8] sm:$0xf]  ;;  %v1301_v6 = vld [vmem:[%s1845_s1 + $0xf4] sm:$0xf0] }
   0x3   :  { %v1133_v7 = vor.u32 %v1298_v2, %v1130_v4  ;;  %v1137_v8 = vor.u32 %v1301_v6, %v1136_v5  ;;  %v1299_v9 = vld [vmem:[%s1845_s1 + $0xec] sm:$0xf]  ;;  %v1138_v10 = vld [vmem:[%s1845_s1 + $0xf8] sm:$0xf0]  ;;  %v1112_v11 = vld [vmem:[%s1845_s1 + $0xc0] sm:$0xf] }
   0x4   :  { %246 = vmatpush.bf16.msra.mxu0 %v1129_v3  ;;  %v1141_v12 = vor.u32 %v1299_v9, %v1138_v10  ;;  %v1296_v13 = vld [vmem:[%s1845_s1 + $0xcc] sm:$0xf0]  ;;  %v1294_v14 = vld [vmem:[%s1845_s1 + $0xc4] sm:$0xf]  ;;  %v1114_v15 = vld [vmem:[%s1845_s1 + $0xd0] sm:$0xf0] }
   0x5   :  { %295 = vmatpush.bf16.msra.mxu1 %v1133_v7  ;;  %344 = vmatpush.bf16.msra.mxu2 %v1137_v8  ;;  %v1113_v16 = vor.u32 %v1296_v13, %v1112_v11  ;;  %v1117_v17 = vor.u32 %v1294_v14, %v1114_v15  ;;  %v1120_v18 = vld [vmem:[%s1845_s1 + $0xc8] sm:$0xf]  ;;  %v1297_v19 = vld [vmem:[%s1845_s1 + $0xd4] sm:$0xf0]  ;;  %v1295_v20 = vld [vmem:[%s1845_s1 + $0xcc] sm:$0xf] }
   0x6   :  { %393 = vmatpush.bf16.msra.mxu3 %v1141_v12  ;;  %v1121_v21 = vor.u32 %v1297_v19, %v1120_v18  ;;  %v1122_v22 = vld [vmem:[%s1845_s1 + $0xd8] sm:$0xf0]  ;;  %v1096_v23 = vld [vmem:[%s1845_s1 + $0xa0] sm:$0xf]  ;;  %v1292_v24 = vld [vmem:[%s1845_s1 + $0xac] sm:$0xf0] }
   0x7   :  { %v1125_v25 = vor.u32 %v1295_v20, %v1122_v22  ;;  %v1290_v26 = vld [vmem:[%s1845_s1 + $0xa4] sm:$0xf]  ;;  %v1098_v27 = vld [vmem:[%s1845_s1 + $0xb0] sm:$0xf0]  ;;  %v1104_v28 = vld [vmem:[%s1845_s1 + $0xa8] sm:$0xf]  ;;  %v1097_v29 = vor.u32 %v1292_v24, %v1096_v23 }
   0x8   :  { %247 = vmatpush.bf16.msra.mxu0 %v1113_v16  ;;  %v1293_v30 = vld [vmem:[%s1845_s1 + $0xb4] sm:$0xf0]  ;;  %v1291_v31 = vld [vmem:[%s1845_s1 + $0xac] sm:$0xf]  ;;  %v1106_v32 = vld [vmem:[%s1845_s1 + $0xb8] sm:$0xf0]  ;;  %v1101_v33 = vor.u32 %v1290_v26, %v1098_v27 }
   0x9   :  { %296 = vmatpush.bf16.msra.mxu1 %v1117_v17  ;;  %345 = vmatpush.bf16.msra.mxu2 %v1121_v21  ;;  %v1105_v34 = vor.u32 %v1293_v30, %v1104_v28  ;;  %v1080_v35 = vld [vmem:[%s1845_s1 + $0x80] sm:$0xf]  ;;  %v1288_v36 = vld [vmem:[%s1845_s1 + $0x8c] sm:$0xf0]  ;;  %v1286_v37 = vld [vmem:[%s1845_s1 + $0x84] sm:$0xf]  ;;  %v1109_v38 = vor.u32 %v1291_v31, %v1106_v32 }
   0xa   :  { %394 = vmatpush.bf16.msra.mxu3 %v1125_v25  ;;  %v1082_v39 = vld [vmem:[%s1845_s1 + $0x90] sm:$0xf0]  ;;  %v1088_v40 = vld [vmem:[%s1845_s1 + $0x88] sm:$0xf]  ;;  %v1289_v41 = vld [vmem:[%s1845_s1 + $0x94] sm:$0xf0]  ;;  %v1081_v44 = vor.u32 %v1288_v36, %v1080_v35 }
   0xb   :  { %v1287_v42 = vld [vmem:[%s1845_s1 + $0x8c] sm:$0xf]  ;;  %v1090_v43 = vld [vmem:[%s1845_s1 + $0x98] sm:$0xf0]  ;;  %v1085_v45 = vor.u32 %v1286_v37, %v1082_v39  ;;  %v1089_v46 = vor.u32 %v1289_v41, %v1088_v40  ;;  %v1064_v47 = vld [vmem:[%s1845_s1 + $0x60] sm:$0xf] }
   0xc   :  { %248 = vmatpush.bf16.msra.mxu0 %v1097_v29  ;;  %v1284_v48 = vld [vmem:[%s1845_s1 + $0x6c] sm:$0xf0]  ;;  %v1282_v49 = vld [vmem:[%s1845_s1 + $0x64] sm:$0xf]  ;;  %v1093_v50 = vor.u32 %v1287_v42, %v1090_v43  ;;  %v1066_v51 = vld [vmem:[%s1845_s1 + $0x70] sm:$0xf0] }
   0xd   :  { %297 = vmatpush.bf16.msra.mxu1 %v1101_v33  ;;  %346 = vmatpush.bf16.msra.mxu2 %v1105_v34  ;;  %v1072_v52 = vld [vmem:[%s1845_s1 + $0x68] sm:$0xf]  ;;  %v1285_v53 = vld [vmem:[%s1845_s1 + $0x74] sm:$0xf0]  ;;  %v1283_v54 = vld [vmem:[%s1845_s1 + $0x6c] sm:$0xf]  ;;  %v1065_v56 = vor.u32 %v1284_v48, %v1064_v47  ;;  %v1069_v57 = vor.u32 %v1282_v49, %v1066_v51 }
   0xe   :  { %395 = vmatpush.bf16.msra.mxu3 %v1109_v38  ;;  %v1074_v55 = vld [vmem:[%s1845_s1 + $0x78] sm:$0xf0]  ;;  %v1073_v58 = vor.u32 %v1285_v53, %v1072_v52  ;;  %v1048_v59 = vld [vmem:[%s1845_s1 + $0x40] sm:$0xf]  ;;  %v1280_v60 = vld [vmem:[%s1845_s1 + $0x4c] sm:$0xf0] }
   0xf   :  { %v1278_v61 = vld [vmem:[%s1845_s1 + $0x44] sm:$0xf]  ;;  %v1077_v62 = vor.u32 %v1283_v54, %v1074_v55  ;;  %v1050_v63 = vld [vmem:[%s1845_s1 + $0x50] sm:$0xf0]  ;;  %v1056_v0 = vld [vmem:[%s1845_s1 + $0x48] sm:$0xf]  ;;  %v1049_v4 = vor.u32 %v1280_v60, %v1048_v59 }
  0x10   :  { %249 = vmatpush.bf16.msra.mxu0 %v1081_v44  ;;  %v1281_v1 = vld [vmem:[%s1845_s1 + $0x54] sm:$0xf0]  ;;  %v1279_v2 = vld [vmem:[%s1845_s1 + $0x4c] sm:$0xf]  ;;  %v1058_v3 = vld [vmem:[%s1845_s1 + $0x58] sm:$0xf0]  ;;  %v1053_v5 = vor.u32 %v1278_v61, %v1050_v63 }
  0x11   :  { %298 = vmatpush.bf16.msra.mxu1 %v1085_v45  ;;  %347 = vmatpush.bf16.msra.mxu2 %v1089_v46  ;;  %v1057_v6 = vor.u32 %v1281_v1, %v1056_v0  ;;  %v1032_v7 = vld [vmem:[%s1845_s1 + $0x20] sm:$0xf]  ;;  %v1276_v8 = vld [vmem:[%s1845_s1 + $0x2c] sm:$0xf0]  ;;  %v1274_v9 = vld [vmem:[%s1845_s1 + $0x24] sm:$0xf]  ;;  %v1061_v10 = vor.u32 %v1279_v2, %v1058_v3 }
  0x12   :  { %396 = vmatpush.bf16.msra.mxu3 %v1093_v50  ;;  %v1034_v11 = vld [vmem:[%s1845_s1 + $0x30] sm:$0xf0]  ;;  %v1040_v12 = vld [vmem:[%s1845_s1 + $0x28] sm:$0xf]  ;;  %v1277_v13 = vld [vmem:[%s1845_s1 + $0x34] sm:$0xf0]  ;;  %v1033_v16 = vor.u32 %v1276_v8, %v1032_v7 }
  0x13   :  { %v1275_v14 = vld [vmem:[%s1845_s1 + $0x2c] sm:$0xf]  ;;  %v1042_v15 = vld [vmem:[%s1845_s1 + $0x38] sm:$0xf0]  ;;  %v1037_v17 = vor.u32 %v1274_v9, %v1034_v11  ;;  %v1041_v18 = vor.u32 %v1277_v13, %v1040_v12  ;;  %v1016_v19 = vld [vmem:[%s1845_s1] sm:$0xf] }
  0x14   :  { %250 = vmatpush.bf16.msra.mxu0 %v1065_v56  ;;  %v1272_v20 = vld [vmem:[%s1845_s1 + $0xc] sm:$0xf0]  ;;  %v1270_v21 = vld [vmem:[%s1845_s1 + $0x4] sm:$0xf]  ;;  %v1045_v22 = vor.u32 %v1275_v14, %v1042_v15  ;;  %v1018_v23 = vld [vmem:[%s1845_s1 + $0x10] sm:$0xf0] }
  0x15   :  { %299 = vmatpush.bf16.msra.mxu1 %v1069_v57  ;;  %348 = vmatpush.bf16.msra.mxu2 %v1073_v58  ;;  %v1024_v24 = vld [vmem:[%s1845_s1 + $0x8] sm:$0xf]  ;;  %v1273_v25 = vld [vmem:[%s1845_s1 + $0x14] sm:$0xf0]  ;;  %v1271_v26 = vld [vmem:[%s1845_s1 + $0xc] sm:$0xf]  ;;  %v1017_v28 = vor.u32 %v1272_v20, %v1016_v19  ;;  %v1021_v31 = vor.u32 %v1270_v21, %v1018_v23 }
  0x16   :  { %397 = vmatpush.bf16.msra.mxu3 %v1077_v62  ;;  %v1026_v27 = vld [vmem:[%s1845_s1 + $0x18] sm:$0xf0]  ;;  %v20_v29 = vld [vmem:[%s1846_s0] sm:$0xff]  ;;  %v21_v30 = vld [vmem:[%s1846_s0 + $0x8] sm:$0xff]  ;;  %v1025_v32 = vor.u32 %v1273_v25, %v1024_v24 }
  0x17   :  { %v1029_v33 = vor.u32 %v1271_v26, %v1026_v27  ;;  %v1325_v34 = vld [vmem:[%s1847_s3 + $0xb8] sm:$0xff]  ;;  %v36_v35 = vpack.c.bf16 %v21_v30, %v20_v29  ;;  %v1324_v39 = vld [vmem:[%s1847_s3 + $0xb0] sm:$0xff]  ;;  %v1323_v46 = vld [vmem:[%s1847_s3 + $0xa8] sm:$0xff] }
  0x18   :  { %251 = vmatpush.bf16.msra.mxu0 %v1049_v4  ;;  %v1333_v36 = vld [vmem:[%s1847_s3 + $0xf8] sm:$0xff]  ;;  %v1308_v40 = vld [vmem:[%s1847_s3 + $0x30] sm:$0xff]  ;;  %v1307_v47 = vld [vmem:[%s1847_s3 + $0x28] sm:$0xff] }
  0x19   :  { %300 = vmatpush.bf16.msra.mxu1 %v1053_v5  ;;  %349 = vmatpush.bf16.msra.mxu2 %v1057_v6  ;;  %v1309_v37 = vld [vmem:[%s1847_s3 + $0x38] sm:$0xff]  ;;  %v1332_v41 = vld [vmem:[%s1847_s3 + $0xf0] sm:$0xff]  ;;  %v1331_v48 = vld [vmem:[%s1847_s3 + $0xe8] sm:$0xff] }
  0x1a   :  { %398 = vmatpush.bf16.msra.mxu3 %v1061_v10  ;;  %v1317_v38 = vld [vmem:[%s1847_s3 + $0x78] sm:$0xff]  ;;  %v1316_v42 = vld [vmem:[%s1847_s3 + $0x70] sm:$0xff]  ;;  %v1315_v49 = vld [vmem:[%s1847_s3 + $0x68] sm:$0xff] }
  0x1b   :  { %v22_v43 = vld [vmem:[%s1846_s0 + $0x10] sm:$0xff]  ;;  %v23_v44 = vld [vmem:[%s1846_s0 + $0x18] sm:$0xff]  ;;  %v24_v50 = vld [vmem:[%s1846_s0 + $0x20] sm:$0xff] }
  0x1c   :  { %252 = vmatpush.bf16.msra.mxu0 %v1033_v16  ;;  %v37_v45 = vpack.c.bf16 %v23_v44, %v22_v43  ;;  %v25_v51 = vld [vmem:[%s1846_s0 + $0x28] sm:$0xff]  ;;  %v1322_v53 = vld [vmem:[%s1847_s3 + $0xa0] sm:$0xff]  ;;  %v26_v57 = vld [vmem:[%s1846_s0 + $0x30] sm:$0xff] }
  0x1d   :  { %301 = vmatpush.bf16.msra.mxu1 %v1037_v17  ;;  %350 = vmatpush.bf16.msra.mxu2 %v1041_v18  ;;  %v38_v52 = vpack.c.bf16 %v25_v51, %v24_v50  ;;  %v1306_v54 = vld [vmem:[%s1847_s3 + $0x20] sm:$0xff]  ;;  %v27_v58 = vld [vmem:[%s1846_s0 + $0x38] sm:$0xff]  ;;  %v29_v1 = vld [vmem:[%s1846_s0 + $0x48] sm:$0xff] }
  0x1e   :  { %399 = vmatpush.bf16.msra.mxu3 %v1045_v22  ;;  %v1330_v55 = vld [vmem:[%s1847_s3 + $0xe0] sm:$0xff]  ;;  %v39_v59 = vpack.c.bf16 %v27_v58, %v26_v57  ;;  %v1321_v60 = vld [vmem:[%s1847_s3 + $0x98] sm:$0xff]  ;;  %v1320_v3 = vld [vmem:[%s1847_s3 + $0x90] sm:$0xff] }
  0x1f   :  { %v1314_v56 = vld [vmem:[%s1847_s3 + $0x60] sm:$0xff]  ;;  %v1305_v61 = vld [vmem:[%s1847_s3 + $0x18] sm:$0xff]  ;;  %v1304_v4 = vld [vmem:[%s1847_s3 + $0x10] sm:$0xff] }
  0x20   :  { %253 = vmatpush.bf16.msra.mxu0 %v1017_v28  ;;  %v1329_v62 = vld [vmem:[%s1847_s3 + $0xd8] sm:$0xff]  ;;  %v28_v0 = vld [vmem:[%s1846_s0 + $0x40] sm:$0xff]  ;;  %v1328_v5 = vld [vmem:[%s1847_s3 + $0xd0] sm:$0xff] }
  0x21   :  { %302 = vmatpush.bf16.msra.mxu1 %v1021_v31  ;;  %351 = vmatpush.bf16.msra.mxu2 %v1025_v32  ;;  %v1313_v63 = vld [vmem:[%s1847_s3 + $0x58] sm:$0xff]  ;;  %v40_v2 = vpack.c.bf16 %v29_v1, %v28_v0  ;;  %v1312_v6 = vld [vmem:[%s1847_s3 + $0x50] sm:$0xff]  ;;  %v1319_v10 = vld [vmem:[%s1847_s3 + $0x88] sm:$0xff] }
  0x22   :  { %400 = vmatpush.bf16.msra.mxu3 %v1029_v33  ;;  %v30_v7 = vld [vmem:[%s1846_s0 + $0x50] sm:$0xff]  ;;  %v31_v8 = vld [vmem:[%s1846_s0 + $0x58] sm:$0xff]  ;;  %v1303_v11 = vld [vmem:[%s1847_s3 + $0x8] sm:$0xff] }
  0x23   :  { %254 = vmatmul.bf16.vlgmr.msra.gmra.mxu0 %v36_v35  ;;  %v41_v9 = vpack.c.bf16 %v31_v8, %v30_v7  ;;  %v1327_v12 = vld [vmem:[%s1847_s3 + $0xc8] sm:$0xff]  ;;  %v32_v14 = vld [vmem:[%s1846_s0 + $0x60] sm:$0xff]  ;;  %v34_v20 = vld [vmem:[%s1846_s0 + $0x70] sm:$0xff] }
  0x24   :  { %303 = vmatmul.bf16.vlgmr.msra.gmra.mxu1 %v36_v35  ;;  %352 = vmatmul.bf16.vlgmr.msra.gmra.mxu2 %v36_v35  ;;  %v1311_v13 = vld [vmem:[%s1847_s3 + $0x48] sm:$0xff]  ;;  %v1318_v17 = vld [vmem:[%s1847_s3 + $0x80] sm:$0xff]  ;;  %v35_v21 = vld [vmem:[%s1846_s0 + $0x78] sm:$0xff] }
  0x25   :  { %896 = vmatpush.bf16.msrb.mxu2 %v1325_v34  ;;  %401 = vmatmul.bf16.vlgmr.msra.gmra.mxu3 %v36_v35  ;;  %v33_v15 = vld [vmem:[%s1846_s0 + $0x68] sm:$0xff]  ;;  %v1302_v18 = vld [vmem:[%s1847_s3] sm:$0xff]  ;;  %v43_v23 = vpack.c.bf16 %v35_v21, %v34_v20 }
  0x26   :  { %945 = vmatpush.bf16.msrb.mxu3 %v1333_v36  ;;  %798 = vmatpush.bf16.msrb.mxu0 %v1309_v37  ;;  %v42_v16 = vpack.c.bf16 %v33_v15, %v32_v14  ;;  %v1326_v19 = vld [vmem:[%s1847_s3 + $0xc0] sm:$0xff] }
  0x27   :  { %847 = vmatpush.bf16.msrb.mxu1 %v1317_v38  ;;  %v1310_v22 = vld [vmem:[%s1847_s3 + $0x40] sm:$0xff] }
  0x28   :  { %v76_v24 = vld [vmem:[%s1848_s2] sm:$0xf] }
  0x29   :  { %897 = vmatpush.bf16.msrb.mxu2 %v1324_v39  ;;  %v1704_v26 = vperm.slane %v76_v24, 0  ;;  %v1706_v28 = vperm.slane %v76_v24, 1  ;;  %v1711_v38 = vperm.slane %v76_v24, 2 }
  0x2a   :  { %946 = vmatpush.bf16.msrb.mxu3 %v1332_v41  ;;  %799 = vmatpush.bf16.msrb.mxu0 %v1308_v40  ;;  %v1714_v40 = vperm.slane %v76_v24, 3 }
  0x2b   :  { %848 = vmatpush.bf16.msrb.mxu1 %v1316_v42 }
  0x2d   :  { %898 = vmatpush.bf16.msrb.mxu2 %v1323_v46 }
  0x2e   :  { %800 = vmatpush.bf16.msrb.mxu0 %v1307_v47  ;;  %947 = vmatpush.bf16.msrb.mxu3 %v1331_v48 }
  0x2f   :  { %849 = vmatpush.bf16.msrb.mxu1 %v1315_v49 }
  0x31   :  { %899 = vmatpush.bf16.msrb.mxu2 %v1322_v53 }
  0x32   :  { %801 = vmatpush.bf16.msrb.mxu0 %v1306_v54  ;;  %948 = vmatpush.bf16.msrb.mxu3 %v1330_v55 }
  0x33   :  { %259 = vmatmul.bf16.gmra.mxu0 %v37_v45  ;;  %850 = vmatpush.bf16.msrb.mxu1 %v1314_v56 }
  0x34   :  { %308 = vmatmul.bf16.gmra.mxu1 %v37_v45  ;;  %357 = vmatmul.bf16.gmra.mxu2 %v37_v45 }
  0x35   :  { %406 = vmatmul.bf16.gmra.mxu3 %v37_v45  ;;  %900 = vmatpush.bf16.msrb.mxu2 %v1321_v60 }
  0x36   :  { %802 = vmatpush.bf16.msrb.mxu0 %v1305_v61  ;;  %949 = vmatpush.bf16.msrb.mxu3 %v1329_v62 }
  0x37   :  { %851 = vmatpush.bf16.msrb.mxu1 %v1313_v63 }
  0x39   :  { %901 = vmatpush.bf16.msrb.mxu2 %v1320_v3 }
  0x3a   :  { %803 = vmatpush.bf16.msrb.mxu0 %v1304_v4  ;;  %950 = vmatpush.bf16.msrb.mxu3 %v1328_v5 }
  0x3b   :  { %852 = vmatpush.bf16.msrb.mxu1 %v1312_v6 }
  0x3d   :  { %902 = vmatpush.bf16.msrb.mxu2 %v1319_v10 }
  0x3e   :  { %804 = vmatpush.bf16.msrb.mxu0 %v1303_v11  ;;  %951 = vmatpush.bf16.msrb.mxu3 %v1327_v12 }
  0x3f   :  { %853 = vmatpush.bf16.msrb.mxu1 %v1311_v13 }
  0x41   :  { %903 = vmatpush.bf16.msrb.mxu2 %v1318_v17 }
  0x42   :  { %805 = vmatpush.bf16.msrb.mxu0 %v1302_v18  ;;  %952 = vmatpush.bf16.msrb.mxu3 %v1326_v19 }
  0x43   :  { %264 = vmatmul.bf16.gmra.mxu0 %v38_v52  ;;  %854 = vmatpush.bf16.msrb.mxu1 %v1310_v22 }
  0x44   :  { %313 = vmatmul.bf16.gmra.mxu1 %v38_v52  ;;  %362 = vmatmul.bf16.gmra.mxu2 %v38_v52 }
  0x45   :  { %411 = vmatmul.bf16.gmra.mxu3 %v38_v52 }
  0x53   :  { %269 = vmatmul.bf16.gmra.mxu0 %v39_v59 }
  0x54   :  { %318 = vmatmul.bf16.gmra.mxu1 %v39_v59  ;;  %367 = vmatmul.bf16.gmra.mxu2 %v39_v59 }
  0x55   :  { %416 = vmatmul.bf16.gmra.mxu3 %v39_v59 }
  0x63   :  { %274 = vmatmul.bf16.gmra.mxu0 %v40_v2 }
  0x64   :  { %323 = vmatmul.bf16.gmra.mxu1 %v40_v2  ;;  %372 = vmatmul.bf16.gmra.mxu2 %v40_v2 }
  0x65   :  { %421 = vmatmul.bf16.gmra.mxu3 %v40_v2 }
  0x73   :  { %279 = vmatmul.bf16.gmra.mxu0 %v41_v9 }
  0x74   :  { %328 = vmatmul.bf16.gmra.mxu1 %v41_v9  ;;  %377 = vmatmul.bf16.gmra.mxu2 %v41_v9 }
  0x75   :  { %426 = vmatmul.bf16.gmra.mxu3 %v41_v9 }
  0x83   :  { %284 = vmatmul.bf16.gmra.mxu0 %v42_v16 }
  0x84   :  { %333 = vmatmul.bf16.gmra.mxu1 %v42_v16  ;;  %382 = vmatmul.bf16.gmra.mxu2 %v42_v16 }
  0x85   :  { %431 = vmatmul.bf16.gmra.mxu3 %v42_v16 }
  0x93   :  { %289 = vmatmul.bf16.gmra.mxu0 %v43_v23 }
  0x94   :  { %338 = vmatmul.bf16.gmra.mxu1 %v43_v23  ;;  %387 = vmatmul.bf16.gmra.mxu2 %v43_v23 }
  0x95   :  { %436 = vmatmul.bf16.gmra.mxu3 %v43_v23 }
  0xa0   :  { %v255_v25 = vpop.f32.mrf.mxu0 }
  0xa1   :  { %v304_v27 = vpop.f32.mrf.mxu1  ;;  %v256_v29 = vadd.f32 %v255_v25, %v1704_v26 }
  0xa2   :  { %v305_v30 = vadd.f32 %v304_v27, %v1706_v28 }
  0xa3   :  { %v442_v34 = vmax.f32 %v256_v29, 0.0 }
  0xa4   :  { %v443_v37 = vmax.f32 %v305_v30, 0.0 }
  0xa7   :  { %v353_v31 = vpop.f32.mrf.mxu2 }
  0xa8   :  { %v402_v32 = vpop.f32.mrf.mxu3  ;;  %v257_v33 = vpop.f32.mrf.mxu0  ;;  %v354_v44 = vadd.f32 %v353_v31, %v1711_v38 }
  0xa9   :  { %v258_v35 = vadd.f32 %v257_v33, %v1704_v26  ;;  %v306_v36 = vpop.f32.mrf.mxu1  ;;  %v403_v46 = vadd.f32 %v402_v32, %v1714_v40 }
  0xaa   :  { %v307_v39 = vadd.f32 %v306_v36, %v1706_v28  ;;  %v444_v53 = vmax.f32 %v354_v44, 0.0 }
  0xab   :  { %v446_v41 = vmax.f32 %v258_v35, 0.0  ;;  %v445_v55 = vmax.f32 %v403_v46, 0.0 }
  0xac   :  { %v447_v42 = vmax.f32 %v307_v39, 0.0 }
  0xad   :  { %v506_v43 = vpack.c.bf16 %v446_v41, %v442_v34 }
  0xae   :  { %v507_v45 = vpack.c.bf16 %v447_v42, %v443_v37 }
  0xaf   :  { %v355_v47 = vpop.f32.mrf.mxu2  ;;  %806 = vmatmul.bf16.vlgmr.msrb.gmra.mxu0 %v506_v43 }
  0xb0   :  { %v356_v48 = vadd.f32 %v355_v47, %v1711_v38  ;;  %v404_v49 = vpop.f32.mrf.mxu3  ;;  %855 = vmatmul.bf16.vlgmr.msrb.gmra.mxu1 %v507_v45  ;;  %v260_v50 = vpop.f32.mrf.mxu0 }
  0xb1   :  { %v405_v51 = vadd.f32 %v404_v49, %v1714_v40  ;;  %v309_v52 = vpop.f32.mrf.mxu1  ;;  %v261_v58 = vadd.f32 %v260_v50, %v1704_v26 }
  0xb2   :  { %v448_v54 = vmax.f32 %v356_v48, 0.0  ;;  %v310_v60 = vadd.f32 %v309_v52, %v1706_v28 }
  0xb3   :  { %v449_v56 = vmax.f32 %v405_v51, 0.0  ;;  %v450_v0 = vmax.f32 %v261_v58, 0.0 }
  0xb4   :  { %v508_v57 = vpack.c.bf16 %v448_v54, %v444_v53  ;;  %v451_v3 = vmax.f32 %v310_v60, 0.0 }
  0xb5   :  { %v509_v59 = vpack.c.bf16 %v449_v56, %v445_v55 }
  0xb6   :  { %904 = vmatmul.bf16.vlgmr.msrb.gmra.mxu2 %v508_v57 }
  0xb7   :  { %953 = vmatmul.bf16.vlgmr.msrb.gmra.mxu3 %v509_v59  ;;  %v358_v61 = vpop.f32.mrf.mxu2 }
  0xb8   :  { %v407_v62 = vpop.f32.mrf.mxu3  ;;  %v262_v63 = vpop.f32.mrf.mxu0  ;;  %v359_v8 = vadd.f32 %v358_v61, %v1711_v38 }
  0xb9   :  { %v263_v1 = vadd.f32 %v262_v63, %v1704_v26  ;;  %v311_v2 = vpop.f32.mrf.mxu1  ;;  %v408_v10 = vadd.f32 %v407_v62, %v1714_v40 }
  0xba   :  { %v312_v4 = vadd.f32 %v311_v2, %v1706_v28  ;;  %v452_v17 = vmax.f32 %v359_v8, 0.0 }
  0xbb   :  { %v454_v5 = vmax.f32 %v263_v1, 0.0  ;;  %v453_v19 = vmax.f32 %v408_v10, 0.0 }
  0xbc   :  { %v455_v6 = vmax.f32 %v312_v4, 0.0 }
  0xbd   :  { %v510_v7 = vpack.c.bf16 %v454_v5, %v450_v0 }
  0xbe   :  { %v511_v9 = vpack.c.bf16 %v455_v6, %v451_v3 }
  0xbf   :  { %v360_v11 = vpop.f32.mrf.mxu2  ;;  %811 = vmatmul.bf16.gmra.mxu0 %v510_v7 }
  0xc0   :  { %v361_v12 = vadd.f32 %v360_v11, %v1711_v38  ;;  %v409_v13 = vpop.f32.mrf.mxu3  ;;  %860 = vmatmul.bf16.gmra.mxu1 %v511_v9  ;;  %v265_v14 = vpop.f32.mrf.mxu0 }
  0xc1   :  { %v410_v15 = vadd.f32 %v409_v13, %v1714_v40  ;;  %v314_v16 = vpop.f32.mrf.mxu1  ;;  %v266_v22 = vadd.f32 %v265_v14, %v1704_v26 }
  0xc2   :  { %v456_v18 = vmax.f32 %v361_v12, 0.0  ;;  %v315_v24 = vadd.f32 %v314_v16, %v1706_v28 }
  0xc3   :  { %v457_v20 = vmax.f32 %v410_v15, 0.0  ;;  %v458_v30 = vmax.f32 %v266_v22, 0.0 }
  0xc4   :  { %v512_v21 = vpack.c.bf16 %v456_v18, %v452_v17  ;;  %v459_v33 = vmax.f32 %v315_v24, 0.0 }
  0xc5   :  { %v513_v23 = vpack.c.bf16 %v457_v20, %v453_v19 }
  0xc6   :  { %909 = vmatmul.bf16.gmra.mxu2 %v512_v21 }
  0xc7   :  { %958 = vmatmul.bf16.gmra.mxu3 %v513_v23  ;;  %v363_v25 = vpop.f32.mrf.mxu2 }
  0xc8   :  { %v412_v27 = vpop.f32.mrf.mxu3  ;;  %v267_v29 = vpop.f32.mrf.mxu0  ;;  %v364_v39 = vadd.f32 %v363_v25, %v1711_v38 }
  0xc9   :  { %v268_v31 = vadd.f32 %v267_v29, %v1704_v26  ;;  %v316_v32 = vpop.f32.mrf.mxu1  ;;  %v413_v42 = vadd.f32 %v412_v27, %v1714_v40 }
  0xca   :  { %v317_v34 = vadd.f32 %v316_v32, %v1706_v28  ;;  %v460_v49 = vmax.f32 %v364_v39, 0.0 }
  0xcb   :  { %v462_v35 = vmax.f32 %v268_v31, 0.0  ;;  %v461_v51 = vmax.f32 %v413_v42, 0.0 }
  0xcc   :  { %v463_v36 = vmax.f32 %v317_v34, 0.0 }
  0xcd   :  { %v514_v37 = vpack.c.bf16 %v462_v35, %v458_v30 }
  0xce   :  { %v515_v41 = vpack.c.bf16 %v463_v36, %v459_v33 }
  0xcf   :  { %v365_v43 = vpop.f32.mrf.mxu2  ;;  %816 = vmatmul.bf16.gmra.mxu0 %v514_v37 }
  0xd0   :  { %v366_v44 = vadd.f32 %v365_v43, %v1711_v38  ;;  %v414_v45 = vpop.f32.mrf.mxu3  ;;  %865 = vmatmul.bf16.gmra.mxu1 %v515_v41  ;;  %v270_v46 = vpop.f32.mrf.mxu0 }
  0xd1   :  { %v415_v47 = vadd.f32 %v414_v45, %v1714_v40  ;;  %v319_v48 = vpop.f32.mrf.mxu1  ;;  %v271_v54 = vadd.f32 %v270_v46, %v1704_v26 }
  0xd2   :  { %v464_v50 = vmax.f32 %v366_v44, 0.0  ;;  %v320_v56 = vadd.f32 %v319_v48, %v1706_v28 }
  0xd3   :  { %v465_v52 = vmax.f32 %v415_v47, 0.0  ;;  %v466_v60 = vmax.f32 %v271_v54, 0.0 }
  0xd4   :  { %v516_v53 = vpack.c.bf16 %v464_v50, %v460_v49  ;;  %v467_v63 = vmax.f32 %v320_v56, 0.0 }
  0xd5   :  { %v517_v55 = vpack.c.bf16 %v465_v52, %v461_v51 }
  0xd6   :  { %914 = vmatmul.bf16.gmra.mxu2 %v516_v53 }
  0xd7   :  { %963 = vmatmul.bf16.gmra.mxu3 %v517_v55  ;;  %v368_v57 = vpop.f32.mrf.mxu2 }
  0xd8   :  { %v417_v58 = vpop.f32.mrf.mxu3  ;;  %v272_v59 = vpop.f32.mrf.mxu0  ;;  %v369_v4 = vadd.f32 %v368_v57, %v1711_v38 }
  0xd9   :  { %v273_v61 = vadd.f32 %v272_v59, %v1704_v26  ;;  %v321_v62 = vpop.f32.mrf.mxu1  ;;  %v418_v6 = vadd.f32 %v417_v58, %v1714_v40 }
  0xda   :  { %v322_v0 = vadd.f32 %v321_v62, %v1706_v28  ;;  %v468_v13 = vmax.f32 %v369_v4, 0.0 }
  0xdb   :  { %v470_v1 = vmax.f32 %v273_v61, 0.0  ;;  %v469_v15 = vmax.f32 %v418_v6, 0.0 }
  0xdc   :  { %v471_v2 = vmax.f32 %v322_v0, 0.0 }
  0xdd   :  { %v518_v3 = vpack.c.bf16 %v470_v1, %v466_v60 }
  0xde   :  { %v519_v5 = vpack.c.bf16 %v471_v2, %v467_v63 }
  0xdf   :  { %v370_v7 = vpop.f32.mrf.mxu2  ;;  %821 = vmatmul.bf16.gmra.mxu0 %v518_v3 }
  0xe0   :  { %v371_v8 = vadd.f32 %v370_v7, %v1711_v38  ;;  %v419_v9 = vpop.f32.mrf.mxu3  ;;  %870 = vmatmul.bf16.gmra.mxu1 %v519_v5  ;;  %v275_v10 = vpop.f32.mrf.mxu0 }
  0xe1   :  { %v420_v11 = vadd.f32 %v419_v9, %v1714_v40  ;;  %v324_v12 = vpop.f32.mrf.mxu1  ;;  %v276_v18 = vadd.f32 %v275_v10, %v1704_v26 }
  0xe2   :  { %v472_v14 = vmax.f32 %v371_v8, 0.0  ;;  %v325_v20 = vadd.f32 %v324_v12, %v1706_v28 }
  0xe3   :  { %v473_v16 = vmax.f32 %v420_v11, 0.0  ;;  %v474_v24 = vmax.f32 %v276_v18, 0.0 }
  0xe4   :  { %v520_v17 = vpack.c.bf16 %v472_v14, %v468_v13  ;;  %v475_v29 = vmax.f32 %v325_v20, 0.0 }
  0xe5   :  { %v521_v19 = vpack.c.bf16 %v473_v16, %v469_v15 }
  0xe6   :  { %919 = vmatmul.bf16.gmra.mxu2 %v520_v17 }
  0xe7   :  { %968 = vmatmul.bf16.gmra.mxu3 %v521_v19  ;;  %v373_v21 = vpop.f32.mrf.mxu2 }
  0xe8   :  { %v422_v22 = vpop.f32.mrf.mxu3  ;;  %v277_v23 = vpop.f32.mrf.mxu0  ;;  %v374_v34 = vadd.f32 %v373_v21, %v1711_v38 }
  0xe9   :  { %v278_v25 = vadd.f32 %v277_v23, %v1704_v26  ;;  %v326_v27 = vpop.f32.mrf.mxu1  ;;  %v423_v36 = vadd.f32 %v422_v22, %v1714_v40 }
  0xea   :  { %v327_v30 = vadd.f32 %v326_v27, %v1706_v28  ;;  %v476_v45 = vmax.f32 %v374_v34, 0.0 }
  0xeb   :  { %v478_v31 = vmax.f32 %v278_v25, 0.0  ;;  %v477_v47 = vmax.f32 %v423_v36, 0.0 }
  0xec   :  { %v479_v32 = vmax.f32 %v327_v30, 0.0 }
  0xed   :  { %v522_v33 = vpack.c.bf16 %v478_v31, %v474_v24 }
  0xee   :  { %v523_v35 = vpack.c.bf16 %v479_v32, %v475_v29 }
  0xef   :  { %v375_v37 = vpop.f32.mrf.mxu2  ;;  %826 = vmatmul.bf16.gmra.mxu0 %v522_v33 }
  0xf0   :  { %v376_v39 = vadd.f32 %v375_v37, %v1711_v38  ;;  %v424_v41 = vpop.f32.mrf.mxu3  ;;  %875 = vmatmul.bf16.gmra.mxu1 %v523_v35  ;;  %v280_v42 = vpop.f32.mrf.mxu0 }
  0xf1   :  { %v425_v43 = vadd.f32 %v424_v41, %v1714_v40  ;;  %v329_v44 = vpop.f32.mrf.mxu1  ;;  %v281_v51 = vadd.f32 %v280_v42, %v1704_v26 }
  0xf2   :  { %v480_v46 = vmax.f32 %v376_v39, 0.0  ;;  %v330_v52 = vadd.f32 %v329_v44, %v1706_v28 }
  0xf3   :  { %v481_v48 = vmax.f32 %v425_v43, 0.0  ;;  %v482_v56 = vmax.f32 %v281_v51, 0.0 }
  0xf4   :  { %v524_v49 = vpack.c.bf16 %v480_v46, %v476_v45  ;;  %v483_v59 = vmax.f32 %v330_v52, 0.0 }
  0xf5   :  { %v525_v50 = vpack.c.bf16 %v481_v48, %v477_v47 }
  0xf6   :  { %924 = vmatmul.bf16.gmra.mxu2 %v524_v49 }
  0xf7   :  { %973 = vmatmul.bf16.gmra.mxu3 %v525_v50  ;;  %v378_v53 = vpop.f32.mrf.mxu2 }
  0xf8   :  { %v427_v54 = vpop.f32.mrf.mxu3  ;;  %v282_v55 = vpop.f32.mrf.mxu0  ;;  %v379_v0 = vadd.f32 %v378_v53, %v1711_v38 }
  0xf9   :  { %v283_v57 = vadd.f32 %v282_v55, %v1704_v26  ;;  %v331_v58 = vpop.f32.mrf.mxu1  ;;  %v428_v2 = vadd.f32 %v427_v54, %v1714_v40 }
  0xfa   :  { %v332_v60 = vadd.f32 %v331_v58, %v1706_v28  ;;  %v484_v9 = vmax.f32 %v379_v0, 0.0 }
  0xfb   :  { %v486_v61 = vmax.f32 %v283_v57, 0.0  ;;  %v485_v11 = vmax.f32 %v428_v2, 0.0 }
  0xfc   :  { %v487_v62 = vmax.f32 %v332_v60, 0.0 }
  0xfd   :  { %v526_v63 = vpack.c.bf16 %v486_v61, %v482_v56 }
  0xfe   :  { %v527_v1 = vpack.c.bf16 %v487_v62, %v483_v59 }
  0xff   :  { %v380_v3 = vpop.f32.mrf.mxu2  ;;  %831 = vmatmul.bf16.gmra.mxu0 %v526_v63 }
 0x100   :  { %v381_v4 = vadd.f32 %v380_v3, %v1711_v38  ;;  %v429_v5 = vpop.f32.mrf.mxu3  ;;  %880 = vmatmul.bf16.gmra.mxu1 %v527_v1  ;;  %v285_v6 = vpop.f32.mrf.mxu0 }
 0x101   :  { %v430_v7 = vadd.f32 %v429_v5, %v1714_v40  ;;  %v334_v8 = vpop.f32.mrf.mxu1  ;;  %v286_v15 = vadd.f32 %v285_v6, %v1704_v26 }
 0x102   :  { %v488_v10 = vmax.f32 %v381_v4, 0.0  ;;  %v335_v16 = vadd.f32 %v334_v8, %v1706_v28 }
 0x103   :  { %v489_v12 = vmax.f32 %v430_v7, 0.0  ;;  %v490_v20 = vmax.f32 %v286_v15, 0.0 }
 0x104   :  { %v528_v13 = vpack.c.bf16 %v488_v10, %v484_v9  ;;  %v491_v23 = vmax.f32 %v335_v16, 0.0  ;;  %v1779_v9 = vld [vmem:[%s1849_s4] ss:$0 sm:$0xff] }
 0x105   :  { %v529_v14 = vpack.c.bf16 %v489_v12, %v485_v11 }
 0x106   :  { %929 = vmatmul.bf16.gmra.mxu2 %v528_v13 }
 0x107   :  { %978 = vmatmul.bf16.gmra.mxu3 %v529_v14  ;;  %v383_v17 = vpop.f32.mrf.mxu2 }
 0x108   :  { %v432_v18 = vpop.f32.mrf.mxu3  ;;  %v287_v19 = vpop.f32.mrf.mxu0  ;;  %v384_v30 = vadd.f32 %v383_v17, %v1711_v38 }
 0x109   :  { %v288_v21 = vadd.f32 %v287_v19, %v1704_v26  ;;  %v336_v22 = vpop.f32.mrf.mxu1  ;;  %v433_v32 = vadd.f32 %v432_v18, %v1714_v40 }
 0x10a   :  { %v337_v24 = vadd.f32 %v336_v22, %v1706_v28  ;;  %v492_v41 = vmax.f32 %v384_v30, 0.0 }
 0x10b   :  { %v494_v25 = vmax.f32 %v288_v21, 0.0  ;;  %v493_v43 = vmax.f32 %v433_v32, 0.0 }
 0x10c   :  { %v495_v27 = vmax.f32 %v337_v24, 0.0 }
 0x10d   :  { %v530_v29 = vpack.c.bf16 %v494_v25, %v490_v20 }
 0x10e   :  { %v531_v31 = vpack.c.bf16 %v495_v27, %v491_v23 }
 0x10f   :  { %v385_v33 = vpop.f32.mrf.mxu2  ;;  %836 = vmatmul.bf16.gmra.mxu0 %v530_v29 }
 0x110   :  { %v386_v34 = vadd.f32 %v385_v33, %v1711_v38  ;;  %v434_v35 = vpop.f32.mrf.mxu3  ;;  %885 = vmatmul.bf16.gmra.mxu1 %v531_v31  ;;  %v290_v36 = vpop.f32.mrf.mxu0 }
 0x111   :  { %v435_v37 = vadd.f32 %v434_v35, %v1714_v40  ;;  %v339_v39 = vpop.f32.mrf.mxu1  ;;  %v291_v47 = vadd.f32 %v290_v36, %v1704_v26 }
 0x112   :  { %v496_v42 = vmax.f32 %v386_v34, 0.0  ;;  %v340_v48 = vadd.f32 %v339_v39, %v1706_v28 }
 0x113   :  { %v497_v44 = vmax.f32 %v435_v37, 0.0  ;;  %v498_v52 = vmax.f32 %v291_v47, 0.0 }
 0x114   :  { %v532_v45 = vpack.c.bf16 %v496_v42, %v492_v41  ;;  %v499_v55 = vmax.f32 %v340_v48, 0.0 }
 0x115   :  { %v533_v46 = vpack.c.bf16 %v497_v44, %v493_v43 }
 0x116   :  { %934 = vmatmul.bf16.gmra.mxu2 %v532_v45 }
 0x117   :  { %983 = vmatmul.bf16.gmra.mxu3 %v533_v46  ;;  %v388_v49 = vpop.f32.mrf.mxu2 }
 0x118   :  { %v437_v50 = vpop.f32.mrf.mxu3  ;;  %v292_v51 = vpop.f32.mrf.mxu0  ;;  %v389_v60 = vadd.f32 %v388_v49, %v1711_v38 }
 0x119   :  { %v293_v53 = vadd.f32 %v292_v51, %v1704_v26  ;;  %v341_v54 = vpop.f32.mrf.mxu1  ;;  %v438_v62 = vadd.f32 %v437_v50, %v1714_v40 }
 0x11a   :  { %v342_v56 = vadd.f32 %v341_v54, %v1706_v28  ;;  %v500_v2 = vmax.f32 %v389_v60, 0.0 }
 0x11b   :  { %v502_v57 = vmax.f32 %v293_v53, 0.0  ;;  %v501_v4 = vmax.f32 %v438_v62, 0.0 }
 0x11c   :  { %v503_v58 = vmax.f32 %v342_v56, 0.0 }
 0x11d   :  { %v534_v59 = vpack.c.bf16 %v502_v57, %v498_v52 }
 0x11e   :  { %v535_v61 = vpack.c.bf16 %v503_v58, %v499_v55 }
 0x11f   :  { %v390_v63 = vpop.f32.mrf.mxu2  ;;  %841 = vmatmul.bf16.gmra.mxu0 %v534_v59 }
 0x120   :  { %v391_v0 = vadd.f32 %v390_v63, %v1711_v38  ;;  %v439_v1 = vpop.f32.mrf.mxu3  ;;  %890 = vmatmul.bf16.gmra.mxu1 %v535_v61 }
 0x121   :  { %v440_v26 = vadd.f32 %v439_v1, %v1714_v40 }
 0x122   :  { %v504_v3 = vmax.f32 %v391_v0, 0.0 }
 0x123   :  { %v505_v28 = vmax.f32 %v440_v26, 0.0 }
 0x124   :  { %v536_v5 = vpack.c.bf16 %v504_v3, %v500_v2 }
 0x125   :  { %v537_v6 = vpack.c.bf16 %v505_v28, %v501_v4 }
 0x126   :  { %939 = vmatmul.bf16.gmra.mxu2 %v536_v5 }
 0x127   :  { %988 = vmatmul.bf16.gmra.mxu3 %v537_v6 }
 0x12c   :  { %v807_v7 = vpop.f32.mrf.mxu0 }
 0x12d   :  { %v856_v8 = vpop.f32.mrf.mxu1  ;;  %v808_v38 = vadd.f32 %v1779_v9, %v807_v7 }
 0x12f   :  { %v857_v40 = vadd.f32 %v856_v8, %v808_v38 }
 0x134   :  { %v809_v10 = vpop.f32.mrf.mxu0 }
 0x135   :  { %v858_v11 = vpop.f32.mrf.mxu1  ;;  %v810_v15 = vadd.f32 %v1779_v9, %v809_v10 }
 0x137   :  { %v859_v19 = vadd.f32 %v858_v11, %v810_v15 }
 0x139   :  { %v905_v12 = vpop.f32.mrf.mxu2 }
 0x13a   :  { %v906_v13 = vadd.f32 %v905_v12, %v857_v40  ;;  %v954_v14 = vpop.f32.mrf.mxu3 }
 0x13c   :  { %v955_v16 = vadd.f32 %v954_v14, %v906_v13  ;;  %v812_v17 = vpop.f32.mrf.mxu0 }
 0x13d   :  { %v861_v18 = vpop.f32.mrf.mxu1  ;;  %v813_v23 = vadd.f32 %v1779_v9, %v812_v17 }
 0x13e   :  { %994 = vst [vmem:[%s1850_s5] sm:$0xff] %v955_v16 }
 0x13f   :  { %v862_v29 = vadd.f32 %v861_v18, %v813_v23 }
 0x141   :  { %v907_v20 = vpop.f32.mrf.mxu2 }
 0x142   :  { %v908_v21 = vadd.f32 %v907_v20, %v859_v19  ;;  %v956_v22 = vpop.f32.mrf.mxu3 }
 0x144   :  { %v957_v24 = vadd.f32 %v956_v22, %v908_v21  ;;  %v814_v25 = vpop.f32.mrf.mxu0 }
 0x145   :  { %v863_v27 = vpop.f32.mrf.mxu1  ;;  %v815_v33 = vadd.f32 %v1779_v9, %v814_v25 }
 0x146   :  { %995 = vst [vmem:[%s1850_s5 + $0x8] sm:$0xff] %v957_v24 }
 0x147   :  { %v864_v37 = vadd.f32 %v863_v27, %v815_v33 }
 0x149   :  { %v910_v30 = vpop.f32.mrf.mxu2 }
 0x14a   :  { %v911_v31 = vadd.f32 %v910_v30, %v862_v29  ;;  %v959_v32 = vpop.f32.mrf.mxu3 }
 0x14c   :  { %v960_v34 = vadd.f32 %v959_v32, %v911_v31  ;;  %v817_v35 = vpop.f32.mrf.mxu0 }
 0x14d   :  { %v866_v36 = vpop.f32.mrf.mxu1  ;;  %v818_v43 = vadd.f32 %v1779_v9, %v817_v35 }
 0x14e   :  { %996 = vst [vmem:[%s1850_s5 + $0x10] sm:$0xff] %v960_v34 }
 0x14f   :  { %v867_v47 = vadd.f32 %v866_v36, %v818_v43 }
 0x151   :  { %v912_v39 = vpop.f32.mrf.mxu2 }
 0x152   :  { %v913_v41 = vadd.f32 %v912_v39, %v864_v37  ;;  %v961_v42 = vpop.f32.mrf.mxu3 }
 0x154   :  { %v962_v44 = vadd.f32 %v961_v42, %v913_v41  ;;  %v819_v45 = vpop.f32.mrf.mxu0 }
 0x155   :  { %v868_v46 = vpop.f32.mrf.mxu1  ;;  %v820_v51 = vadd.f32 %v1779_v9, %v819_v45 }
 0x156   :  { %997 = vst [vmem:[%s1850_s5 + $0x18] sm:$0xff] %v962_v44 }
 0x157   :  { %v869_v55 = vadd.f32 %v868_v46, %v820_v51 }
 0x159   :  { %v915_v48 = vpop.f32.mrf.mxu2 }
 0x15a   :  { %v916_v49 = vadd.f32 %v915_v48, %v867_v47  ;;  %v964_v50 = vpop.f32.mrf.mxu3 }
 0x15c   :  { %v965_v52 = vadd.f32 %v964_v50, %v916_v49  ;;  %v822_v53 = vpop.f32.mrf.mxu0 }
 0x15d   :  { %v871_v54 = vpop.f32.mrf.mxu1  ;;  %v823_v59 = vadd.f32 %v1779_v9, %v822_v53 }
 0x15e   :  { %998 = vst [vmem:[%s1850_s5 + $0x20] sm:$0xff] %v965_v52 }
 0x15f   :  { %v872_v63 = vadd.f32 %v871_v54, %v823_v59 }
 0x161   :  { %v917_v56 = vpop.f32.mrf.mxu2 }
 0x162   :  { %v918_v57 = vadd.f32 %v917_v56, %v869_v55  ;;  %v966_v58 = vpop.f32.mrf.mxu3 }
 0x164   :  { %v967_v60 = vadd.f32 %v966_v58, %v918_v57  ;;  %v824_v61 = vpop.f32.mrf.mxu0 }
 0x165   :  { %v873_v62 = vpop.f32.mrf.mxu1  ;;  %v825_v2 = vadd.f32 %v1779_v9, %v824_v61 }
 0x166   :  { %999 = vst [vmem:[%s1850_s5 + $0x28] sm:$0xff] %v967_v60 }
 0x167   :  { %v874_v5 = vadd.f32 %v873_v62, %v825_v2 }
 0x169   :  { %v920_v0 = vpop.f32.mrf.mxu2 }
 0x16a   :  { %v921_v1 = vadd.f32 %v920_v0, %v872_v63  ;;  %v969_v26 = vpop.f32.mrf.mxu3 }
 0x16c   :  { %v970_v3 = vadd.f32 %v969_v26, %v921_v1  ;;  %v827_v4 = vpop.f32.mrf.mxu0 }
 0x16d   :  { %v876_v28 = vpop.f32.mrf.mxu1  ;;  %v828_v38 = vadd.f32 %v1779_v9, %v827_v4 }
 0x16e   :  { %1000 = vst [vmem:[%s1850_s5 + $0x30] sm:$0xff] %v970_v3 }
 0x16f   :  { %v877_v12 = vadd.f32 %v876_v28, %v828_v38 }
 0x171   :  { %v922_v6 = vpop.f32.mrf.mxu2 }
 0x172   :  { %v923_v7 = vadd.f32 %v922_v6, %v874_v5  ;;  %v971_v8 = vpop.f32.mrf.mxu3 }
 0x174   :  { %v972_v10 = vadd.f32 %v971_v8, %v923_v7  ;;  %v829_v11 = vpop.f32.mrf.mxu0 }
 0x175   :  { %v878_v40 = vpop.f32.mrf.mxu1  ;;  %v830_v16 = vadd.f32 %v1779_v9, %v829_v11 }
 0x176   :  { %1001 = vst [vmem:[%s1850_s5 + $0x38] sm:$0xff] %v972_v10 }
 0x177   :  { %v879_v20 = vadd.f32 %v878_v40, %v830_v16 }
 0x179   :  { %v925_v13 = vpop.f32.mrf.mxu2 }
 0x17a   :  { %v926_v14 = vadd.f32 %v925_v13, %v877_v12  ;;  %v974_v15 = vpop.f32.mrf.mxu3 }
 0x17c   :  { %v975_v17 = vadd.f32 %v974_v15, %v926_v14  ;;  %v832_v18 = vpop.f32.mrf.mxu0 }
 0x17d   :  { %v881_v19 = vpop.f32.mrf.mxu1  ;;  %v833_v24 = vadd.f32 %v1779_v9, %v832_v18 }
 0x17e   :  { %1002 = vst [vmem:[%s1850_s5 + $0x40] sm:$0xff] %v975_v17 }
 0x17f   :  { %v882_v30 = vadd.f32 %v881_v19, %v833_v24 }
 0x181   :  { %v927_v21 = vpop.f32.mrf.mxu2 }
 0x182   :  { %v928_v22 = vadd.f32 %v927_v21, %v879_v20  ;;  %v976_v23 = vpop.f32.mrf.mxu3 }
 0x184   :  { %v977_v25 = vadd.f32 %v976_v23, %v928_v22  ;;  %v834_v27 = vpop.f32.mrf.mxu0 }
 0x185   :  { %v883_v29 = vpop.f32.mrf.mxu1  ;;  %v835_v34 = vadd.f32 %v1779_v9, %v834_v27 }
 0x186   :  { %1003 = vst [vmem:[%s1850_s5 + $0x48] sm:$0xff] %v977_v25 }
 0x187   :  { %v884_v37 = vadd.f32 %v883_v29, %v835_v34 }
 0x189   :  { %v930_v31 = vpop.f32.mrf.mxu2 }
 0x18a   :  { %v931_v32 = vadd.f32 %v930_v31, %v882_v30  ;;  %v979_v33 = vpop.f32.mrf.mxu3 }
 0x18c   :  { %v980_v35 = vadd.f32 %v979_v33, %v931_v32  ;;  %v837_v36 = vpop.f32.mrf.mxu0 }
 0x18d   :  { %v886_v39 = vpop.f32.mrf.mxu1  ;;  %v838_v44 = vadd.f32 %v1779_v9, %v837_v36 }
 0x18e   :  { %1004 = vst [vmem:[%s1850_s5 + $0x50] sm:$0xff] %v980_v35 }
 0x18f   :  { %v887_v47 = vadd.f32 %v886_v39, %v838_v44 }
 0x191   :  { %v932_v41 = vpop.f32.mrf.mxu2 }
 0x192   :  { %v933_v42 = vadd.f32 %v932_v41, %v884_v37  ;;  %v981_v43 = vpop.f32.mrf.mxu3 }
 0x194   :  { %v982_v45 = vadd.f32 %v981_v43, %v933_v42  ;;  %v839_v46 = vpop.f32.mrf.mxu0 }
 0x195   :  { %v888_v51 = vpop.f32.mrf.mxu1  ;;  %v840_v52 = vadd.f32 %v1779_v9, %v839_v46 }
 0x196   :  { %1005 = vst [vmem:[%s1850_s5 + $0x58] sm:$0xff] %v982_v45 }
 0x197   :  { %v889_v55 = vadd.f32 %v888_v51, %v840_v52 }
 0x199   :  { %v935_v48 = vpop.f32.mrf.mxu2 }
 0x19a   :  { %v936_v49 = vadd.f32 %v935_v48, %v887_v47  ;;  %v984_v50 = vpop.f32.mrf.mxu3 }
 0x19c   :  { %v985_v53 = vadd.f32 %v984_v50, %v936_v49  ;;  %v842_v54 = vpop.f32.mrf.mxu0 }
 0x19d   :  { %v843_v59 = vadd.f32 %v1779_v9, %v842_v54  ;;  %v891_v61 = vpop.f32.mrf.mxu1 }
 0x19e   :  { %1006 = vst [vmem:[%s1850_s5 + $0x60] sm:$0xff] %v985_v53 }
 0x19f   :  { %v892_v62 = vadd.f32 %v891_v61, %v843_v59 }
 0x1a1   :  { %v937_v56 = vpop.f32.mrf.mxu2 }
 0x1a2   :  { %v938_v57 = vadd.f32 %v937_v56, %v889_v55  ;;  %v986_v58 = vpop.f32.mrf.mxu3 }
 0x1a4   :  { %v987_v60 = vadd.f32 %v986_v58, %v938_v57  ;;  %v844_v63 = vpop.f32.mrf.mxu0 }
 0x1a5   :  { %v845_v2 = vadd.f32 %v1779_v9, %v844_v63  ;;  %v893_v4 = vpop.f32.mrf.mxu1 }
 0x1a6   :  { %1007 = vst [vmem:[%s1850_s5 + $0x68] sm:$0xff] %v987_v60 }
 0x1a7   :  { %v894_v28 = vadd.f32 %v893_v4, %v845_v2 }
 0x1a9   :  { %v940_v0 = vpop.f32.mrf.mxu2 }
 0x1aa   :  { %v941_v1 = vadd.f32 %v940_v0, %v892_v62  ;;  %v989_v26 = vpop.f32.mrf.mxu3 }
 0x1ac   :  { %v990_v3 = vadd.f32 %v989_v26, %v941_v1 }
 0x1ae   :  { %1008 = vst [vmem:[%s1850_s5 + $0x70] sm:$0xff] %v990_v3 }
 0x1b1   :  { %v942_v5 = vpop.f32.mrf.mxu2 }
 0x1b2   :  { %v943_v6 = vadd.f32 %v942_v5, %v894_v28  ;;  %v991_v7 = vpop.f32.mrf.mxu3 }
 0x1b4   :  { %v992_v8 = vadd.f32 %v991_v7, %v943_v6 }
 0x1b6   :  { %1009 = vst [vmem:[%s1850_s5 + $0x78] sm:$0xff] %v992_v8 }

</bundles_post_ra>
